<compile_context>
chip_gen: v5e
topology: v5e:2x2
jax: 0.10.0
libtpu: 0.0.40
codegen_flags: <defaults>
</compile_context>

<pallas_src>
import functools
import numpy as np
import jax
import jax.numpy as jnp
from jax import lax
from jax.experimental import pallas as pl
from jax.experimental.pallas import tpu as pltpu


def _round_up(x, m):
    return (x + m - 1) // m * m


@functools.lru_cache(maxsize=None)
def _vmem_limit_bytes():
    # Leave headroom below physical VMEM (v7x: 64 MiB/TC, v5e/v6e: 128 MiB) for the
    # compiler's internal scratch and the double-buffered BlockSpec tiles.
    try:
        cap = int(pltpu.get_tpu_info().vmem_capacity_bytes)
        return max(32 * 1024 * 1024, min(cap - 16 * 1024 * 1024, 100 * 1024 * 1024))
    except Exception:
        return 48 * 1024 * 1024


# ---------------------------------------------------------------------------
# Generic tiled matmul-with-bias kernel (layer-0 input GEMM, vocab projection).
# Optionally fuses a ReLU on the lhs tile.  M / N are padded to multiples of 128
# so tiles never fall back to a huge full-extent VMEM block (e.g. V = 50k).
# ---------------------------------------------------------------------------
def _matmul_bias_kernel(a_ref, b_ref, bias_ref, o_ref, *, apply_relu):
    a = a_ref[...]
    if apply_relu:
        a = jnp.maximum(a, 0).astype(a_ref.dtype)          # fused embedding ReLU (VPU)
    acc = jnp.dot(a, b_ref[...], preferred_element_type=jnp.float32) + bias_ref[...]
    o_ref[...] = acc.astype(o_ref.dtype)


def _pick_tile(dim, candidates=(512, 256, 128)):
    for t in candidates:
        if dim % t == 0:
            return t
    return dim                                              # full extent (small dims only)


def _matmul_bias(a, b, bias, *, apply_relu=False, out_dtype=jnp.float32):
    """a: (M, K) bf16, b: (K, N) bf16, bias: (1, N) f32 -> (M, N) out_dtype."""
    M, K = a.shape
    _, N = b.shape
    Mp, Np = _round_up(M, 128), _round_up(N, 128)
    if Mp != M:
        a = jnp.pad(a, ((0, Mp - M), (0, 0)))
    if Np != N:
        b = jnp.pad(b, ((0, 0), (0, Np - N)))
        bias = jnp.pad(bias, ((0, 0), (0, Np - N)))
    tm, tn = _pick_tile(Mp), _pick_tile(Np)
    kernel = functools.partial(_matmul_bias_kernel, apply_relu=apply_relu)
    out = pl.pallas_call(
        kernel,
        out_shape=jax.ShapeDtypeStruct((Mp, Np), out_dtype),
        grid=(Mp // tm, Np // tn),
        in_specs=[pl.BlockSpec((tm, K), lambda i, j: (i, 0)),
                  pl.BlockSpec((K, tn), lambda i, j: (0, j)),
                  pl.BlockSpec((1, tn), lambda i, j: (0, j))],
        out_specs=pl.BlockSpec((tm, tn), lambda i, j: (i, j)),
        compiler_params=pltpu.CompilerParams(
            dimension_semantics=("parallel", "parallel"),
            vmem_limit_bytes=_vmem_limit_bytes()),
    )(a, b, bias)
    if (Mp, Np) != (M, N):
        out = out[:M, :N]
    return out


# ---------------------------------------------------------------------------
# Sequential packed-LSTM recurrence, chunked over T and tiled over batch.
#   grid = (n_batch_tiles ["parallel"], n_time_chunks ["arbitrary"])
#   xg_ref   : (chunk_T, bt, 4H) bf16  precomputed layer-0 input gates (+ layer-0 bias)
#   lens_ref : (bt, 1)  i32            valid lengths
#   h0/c0    : (NL, bt, H) f32
#   whh0_ref : (H, 4H) bf16            layer-0 recurrent weights (gate order i,f,o,g)
#   wih_r/whh_r : (NL-1, H, 4H) bf16   per-layer weights for layers >= 1
#   bias_r   : (NL-1, 1, 4H) f32       b_ih + b_hh for layers >= 1
# outputs:
#   hout_ref : (chunk_T, bt, H) bf16   masked top-layer hidden (0 past seq end)
#   hn/cn    : (NL, bt, H) f32
# scratch:
#   h_sc/c_sc: (NL, bt, H) f32         state carried across T chunks
# ---------------------------------------------------------------------------
def _lstm_recurrence_kernel(xg_ref, lens_ref, h0_ref, c0_ref,
                            whh0_ref, wih_r_ref, whh_r_ref, bias_r_ref,
                            hout_ref, hn_ref, cn_ref,
                            h_sc, c_sc,
                            *, num_layers, hidden_dim, chunk_t, unroll):
    H = hidden_dim
    ti = pl.program_id(1)

    # First T-chunk of each batch tile: load initial state into the carry scratch.
    @pl.when(ti == 0)
    def _():
        h_sc[...] = h0_ref[...]
        c_sc[...] = c0_ref[...]

    lens = lens_ref[...]                     # (bt, 1) i32, hoisted out of the time loop
    t_base = ti * chunk_t

    def cell(gates, c_prev):
        # gate order (i, f, o, g): one contiguous sigmoid over 3H + one tanh over H (EUP)
        sig = jax.nn.sigmoid(gates[:, :3 * H])
        g = jnp.tanh(gates[:, 3 * H:])
        c_new = sig[:, H:2 * H] * c_prev + sig[:, :H] * g
        h_new = sig[:, 2 * H:3 * H] * jnp.tanh(c_new)
        return h_new, c_new

    # h/c live as values through the chunk loop (vreg / compiler-managed), the VMEM
    # scratch is only touched at chunk boundaries.  Value carries + unrolling let the
    # scheduler overlap layer-0(t+1) with layer-1(t) (wavefront).
    h_init = tuple(h_sc[l] for l in range(num_layers))
    c_init = tuple(c_sc[l] for l in range(num_layers))

    def step(t, carry):
        hs, cs = carry
        mask = lens > (t_base + t)                         # (bt, 1) packed-seq validity

        # ---- layer 0: input GEMM precomputed, only the recurrent GEMM remains ----
        gates = (xg_ref[t].astype(jnp.float32)
                 + jnp.dot(hs[0].astype(jnp.bfloat16), whh0_ref[...],
                           preferred_element_type=jnp.float32))
        h_new, c_new = cell(gates, cs[0])
        h_l = jnp.where(mask, h_new, hs[0])                # freeze state past sequence end
        c_l = jnp.where(mask, c_new, cs[0])
        new_h, new_c = [h_l], [c_l]
        inp = h_l

        # ---- layers >= 1: two dots (no concatenate on the serial critical path) ----
        for l in range(1, num_layers):
            gates = (jnp.dot(inp.astype(jnp.bfloat16), wih_r_ref[l - 1],
                             preferred_element_type=jnp.float32)
                     + jnp.dot(hs[l].astype(jnp.bfloat16), whh_r_ref[l - 1],
                               preferred_element_type=jnp.float32)
                     + bias_r_ref[l - 1])
            h_new, c_new = cell(gates, cs[l])
            h_l = jnp.where(mask, h_new, hs[l])
            c_l = jnp.where(mask, c_new, cs[l])
            new_h.append(h_l)
            new_c.append(c_l)
            inp = h_l

        # pad_packed_sequence(padding_value=0): zero top-layer output past each seq end
        hout_ref[t] = jnp.where(mask, inp, 0.0).astype(hout_ref.dtype)
        return tuple(new_h), tuple(new_c)

    hs, cs = lax.fori_loop(0, chunk_t, step, (h_init, c_init), unroll=unroll)

    for l in range(num_layers):
        h_sc[l] = hs[l]
        c_sc[l] = cs[l]
    hn_ref[...] = h_sc[...]
    cn_ref[...] = c_sc[...]


# ---------------------------------------------------------------------------
# Wrapper
# ---------------------------------------------------------------------------
def decoder_lstm_forward(x_tokens, h0, c0, params, *, pad_token=0,
                         chunk_t=None, unroll=None):
    """x_tokens: (B, L) int32; h0/c0: (NL, B, H) float32.  Returns (y, (hn, cn)),
    y shaped (B, V, T) like the torch module."""
    x_np = np.asarray(x_tokens)
    # lens on host (mirrors `.to('cpu')` in the torch module).  Dynamic T forces one
    # host sync + one compile per distinct T_pad bucket (compile-latency only).
    lens = (x_np != pad_token).sum(axis=1).astype(np.int32)
    T = int(lens.max())
    B = x_np.shape[0]

    emb_table = params["embedding"]
    V, H = emb_table.shape
    NL = params["w_ih"].shape[0]

    # ---- batch / time tiling -------------------------------------------------
    # Batch tiles feed v7x's two TensorCores through the "parallel" grid axis; on
    # single-TC chips (v5e/v6e) the extra tile is just a harmless serial iteration.
    n_b = 2 if (B % 16 == 0) else 1
    bt = B // n_b
    if chunk_t is None:
        # Keep the (chunk_t, bt, 4H) bf16 gate block small so double-buffered xg/hout
        # DMAs of chunk t+1 overlap compute of chunk t and fit v7x's 64 MiB VMEM.
        per_step_bytes = bt * 4 * H * 2
        chunk_t = int(max(8, min(512, (8 * 1024 * 1024) // per_step_bytes)))
    chunk_t = max(1, min(chunk_t, T))
    T_pad = _round_up(T, chunk_t)
    n_t = T_pad // chunk_t
    if unroll is None:
        unroll = 4 if chunk_t % 4 == 0 else (2 if chunk_t % 2 == 0 else 1)

    # Gate reorder: torch (i, f, g, o) -> (i, f, o, g) so sigmoid covers one contiguous
    # 3H slice and tanh one H slice inside the recurrence kernel.
    perm = np.concatenate([np.arange(0, 2 * H),          # i, f
                           np.arange(3 * H, 4 * H),      # o
                           np.arange(2 * H, 3 * H)])     # g
    w_ih = params["w_ih"][:, perm, :]                    # (NL, 4H, H)
    w_hh = params["w_hh"][:, perm, :]
    bias = (params["b_ih"] + params["b_hh"])[:, perm]    # (NL, 4H)

    wih0_t = jnp.transpose(w_ih[0]).astype(jnp.bfloat16)          # (H, 4H)
    whh0_t = jnp.transpose(w_hh[0]).astype(jnp.bfloat16)          # (H, 4H)
    bias0 = bias[0][None, :].astype(jnp.float32)                  # (1, 4H)
    if NL > 1:
        wih_r = jnp.transpose(w_ih[1:], (0, 2, 1)).astype(jnp.bfloat16)  # (NL-1, H, 4H)
        whh_r = jnp.transpose(w_hh[1:], (0, 2, 1)).astype(jnp.bfloat16)
        bias_r = bias[1:, None, :].astype(jnp.float32)                    # (NL-1, 1, 4H)
    else:
        wih_r = jnp.zeros((1, H, 4 * H), jnp.bfloat16)            # unused dummies
        whh_r = jnp.zeros((1, H, 4 * H), jnp.bfloat16)
        bias_r = jnp.zeros((1, 1, 4 * H), jnp.float32)
    NLr = wih_r.shape[0]
    wout_t = jnp.transpose(params["w_out"]).astype(jnp.bfloat16)  # (H, V)
    bout = params["b_out"][None, :].astype(jnp.float32)           # (1, V)
    lens_in = jnp.asarray(lens)[:, None]                          # (B, 1)

    # Time-major token matrix (tiny int32 host transpose) -> the embedding gather comes
    # out time-major directly; no (B,T,H)->(T,B,H) activation transpose HBM pass.
    x_tm = np.full((T_pad, B), pad_token, np.int32)
    x_tm[:T] = x_np[:, :T].T
    tok_tm = jnp.asarray(x_tm).reshape(-1)                        # (T_pad*B,)
    emb_flat = jnp.take(emb_table.astype(jnp.bfloat16), tok_tm, axis=0)  # (T_pad*B, H)

    # (1) layer-0 input GEMM for ALL timesteps, ReLU fused into the lhs, bf16 output.
    xg0 = _matmul_bias(emb_flat, wih0_t, bias0, apply_relu=True,
                       out_dtype=jnp.bfloat16)                    # (T_pad*B, 4H)
    xg0 = xg0.reshape(T_pad, B, 4 * H)                            # time-major

    # (2) sequential recurrence: T-chunked ("arbitrary") x batch-tiled ("parallel").
    rec_kernel = functools.partial(_lstm_recurrence_kernel, num_layers=NL,
                                   hidden_dim=H, chunk_t=chunk_t, unroll=unroll)
    hout_tm, hn, cn = pl.pallas_call(
        rec_kernel,
        out_shape=(
            jax.ShapeDtypeStruct((T_pad, B, H), jnp.bfloat16),
            jax.ShapeDtypeStruct((NL, B, H), jnp.float32),
            jax.ShapeDtypeStruct((NL, B, H), jnp.float32),
        ),
        grid=(n_b, n_t),
        in_specs=[
            pl.BlockSpec((chunk_t, bt, 4 * H), lambda bi, ti: (ti, bi, 0)),
            pl.BlockSpec((bt, 1), lambda bi, ti: (bi, 0)),
            pl.BlockSpec((NL, bt, H), lambda bi, ti: (0, bi, 0)),
            pl.BlockSpec((NL, bt, H), lambda bi, ti: (0, bi, 0)),
            pl.BlockSpec((H, 4 * H), lambda bi, ti: (0, 0)),
            pl.BlockSpec((NLr, H, 4 * H), lambda bi, ti: (0, 0, 0)),
            pl.BlockSpec((NLr, H, 4 * H), lambda bi, ti: (0, 0, 0)),
            pl.BlockSpec((NLr, 1, 4 * H), lambda bi, ti: (0, 0, 0)),
        ],
        out_specs=(
            pl.BlockSpec((chunk_t, bt, H), lambda bi, ti: (ti, bi, 0)),
            pl.BlockSpec((NL, bt, H), lambda bi, ti: (0, bi, 0)),
            pl.BlockSpec((NL, bt, H), lambda bi, ti: (0, bi, 0)),
        ),
        scratch_shapes=[pltpu.VMEM((NL, bt, H), jnp.float32),
                        pltpu.VMEM((NL, bt, H), jnp.float32)],
        compiler_params=pltpu.CompilerParams(
            dimension_semantics=("parallel", "arbitrary"),
            vmem_limit_bytes=_vmem_limit_bytes()),
    )(xg0, lens_in, h0.astype(jnp.float32), c0.astype(jnp.float32),
      whh0_t, wih_r, whh_r, bias_r)

    # (3) vocab projection hoisted out of the time loop: one (T_pad*B, H) x (H, V) GEMM.
    y_flat = _matmul_bias(hout_tm.reshape(T_pad * B, H), wout_t, bout)   # (T_pad*B, V) f32

    # (T_pad, B, V) -> (B, V, T)  == torch `y.permute(0, 2, 1)` after batch-first padding.
    # TODO(synk): fuse this permute into the projection kernel (grid over B, dot_general
    # contracting H, T-lane-dense output blocks on a T padded to a multiple of 128) to
    # save the extra HBM pass over the largest tensor.
    y = jnp.transpose(y_flat.reshape(T_pad, B, V), (1, 2, 0))[:, :, :T]
    return y, (hn, cn)


# ---------------------------------------------------------------------------
# Pure-numpy reference (identical packed-LSTM semantics, torch gate order)
# ---------------------------------------------------------------------------
def _sigmoid(x):
    return 1.0 / (1.0 + np.exp(-x))


def reference_forward(x_tokens, h0, c0, params, pad_token=0):
    x = np.asarray(x_tokens)
    h0 = np.asarray(h0, np.float32)
    c0 = np.asarray(c0, np.float32)
    p = {k: np.asarray(v, np.float32) for k, v in params.items()}
    B, L = x.shape
    V, H = p["embedding"].shape
    NL = p["w_ih"].shape[0]
    lens = (x != pad_token).sum(axis=1).astype(np.int32)
    T = int(lens.max())
    x = x[:, :T]
    xin = np.maximum(p["embedding"][x], 0.0)                       # (B, T, H)
    h = [h0[l].copy() for l in range(NL)]
    c = [c0[l].copy() for l in range(NL)]
    ys = []
    for t in range(T):
        mask = (lens > t).astype(np.float32)[:, None]
        inp = xin[:, t, :]
        for l in range(NL):
            gates = inp @ p["w_ih"][l].T + h[l] @ p["w_hh"][l].T + p["b_ih"][l] + p["b_hh"][l]
            i_g = _sigmoid(gates[:, 0 * H:1 * H])
            f_g = _sigmoid(gates[:, 1 * H:2 * H])
            g_g = np.tanh(gates[:, 2 * H:3 * H])
            o_g = _sigmoid(gates[:, 3 * H:4 * H])
            c_new = f_g * c[l] + i_g * g_g
            h_new = o_g * np.tanh(c_new)
            c[l] = mask * c_new + (1.0 - mask) * c[l]
            h[l] = mask * h_new + (1.0 - mask) * h[l]
            inp = h[l]
        ys.append(mask * h[-1])
    y = np.stack(ys, axis=1)                                       # (B, T, H)
    y = y @ p["w_out"].T + p["b_out"]                              # (B, T, V)
    y = np.transpose(y, (0, 2, 1))                                 # (B, V, T)
    return y, np.stack(h), np.stack(c)


if __name__ == "__main__":
    B, L, H, V, NL = 2, 8, 32, 16, 2
    key = jax.random.PRNGKey(0)
    keys = jax.random.split(key, 12)
    scale = 1.0 / np.sqrt(H)

    params = {
        "embedding": (jax.random.normal(keys[0], (V, H), jnp.float32) * 0.1).at[0].set(0.0),
        "w_ih": jax.random.uniform(keys[1], (NL, 4 * H, H), jnp.float32, -scale, scale),
        "w_hh": jax.random.uniform(keys[2], (NL, 4 * H, H), jnp.float32, -scale, scale),
        "b_ih": jax.random.uniform(keys[3], (NL, 4 * H), jnp.float32, -scale, scale),
        "b_hh": jax.random.uniform(keys[4], (NL, 4 * H), jnp.float32, -scale, scale),
        "w_out": jax.random.uniform(keys[5], (V, H), jnp.float32, -scale, scale),
        "b_out": jax.random.uniform(keys[6], (V,), jnp.float32, -scale, scale),
    }

    x = jax.random.randint(keys[7], (B, L), 1, V, dtype=jnp.int32)
    x = x.at[0, 6:].set(0)          # sequence 0: length 6 (trailing padding)
    h0 = jax.random.normal(keys[8], (NL, B, H), jnp.float32) * 0.1
    c0 = jax.random.normal(keys[9], (NL, B, H), jnp.float32) * 0.1

    y, (hn, cn) = decoder_lstm_forward(x, h0, c0, params)
    jax.block_until_ready((y, hn, cn))

    y_ref, hn_ref, cn_ref = reference_forward(x, h0, c0, params)
    # bf16 MXU operands / bf16 gate staging with f32 accumulation -> loose tolerance
    np.testing.assert_allclose(np.asarray(y), y_ref, rtol=2e-2, atol=2e-2)
    np.testing.assert_allclose(np.asarray(hn), hn_ref, rtol=2e-2, atol=2e-2)
    np.testing.assert_allclose(np.asarray(cn), cn_ref, rtol=2e-2, atol=2e-2)

    print("KERNEL_OK")
</pallas_src>

<mosaic_0001>
module attributes {stable_mosaic.version = 11 : i64} {
  func.func @_matmul_bias_kernel(%arg0: i32, %arg1: i32, %arg2: memref<128x32xbf16, #tpu.memory_space<vmem>>, %arg3: memref<32x128xbf16, #tpu.memory_space<vmem>>, %arg4: memref<1x128xf32, #tpu.memory_space<vmem>>, %arg5: memref<128x128xbf16, #tpu.memory_space<vmem>>) attributes {dimension_semantics = [#tpu.dimension_semantics<parallel>, #tpu.dimension_semantics<parallel>], iteration_bounds = array<i64: 1, 1>, scalar_prefetch = 0 : i64, scratch_operands = 0 : i64, tpu.core_type = #tpu.core_type<tc>, window_params = [{transform_indices = @transform_0, window_bounds = array<i64: 128, 32>}, {transform_indices = @transform_1, window_bounds = array<i64: 32, 128>}, {transform_indices = @transform_2, window_bounds = array<i64: 1, 128>}, {transform_indices = @transform_3, window_bounds = array<i64: 128, 128>}]} {
    %c0 = arith.constant 0 : index
    %c0_0 = arith.constant 0 : index
    %0 = vector.load %arg2[%c0, %c0_0] : memref<128x32xbf16, #tpu.memory_space<vmem>>, vector<128x32xbf16>
    %cst = arith.constant 0.000000e+00 : bf16
    %1 = vector.broadcast %cst : bf16 to vector<128x32xbf16>
    %2 = arith.maximumf %0, %1 : vector<128x32xbf16>
    %c0_1 = arith.constant 0 : index
    %c0_2 = arith.constant 0 : index
    %3 = vector.load %arg3[%c0_1, %c0_2] : memref<32x128xbf16, #tpu.memory_space<vmem>>, vector<32x128xbf16>
    %cst_3 = arith.constant dense<0.000000e+00> : vector<128x128xf32>
    %4 = tpu.matmul %2, %3, %cst_3 {dimension_numbers = #tpu.dot_dimension_numbers<[1], [0], [0], [1], [0, 0, 1, 1], [], []>} : vector<128x32xbf16>, vector<32x128xbf16>, vector<128x128xf32> -> vector<128x128xf32>
    %c0_4 = arith.constant 0 : index
    %c0_5 = arith.constant 0 : index
    %5 = vector.load %arg4[%c0_4, %c0_5] : memref<1x128xf32, #tpu.memory_space<vmem>>, vector<1x128xf32>
    %6 = vector.broadcast %5 : vector<1x128xf32> to vector<128x128xf32>
    %7 = arith.addf %4, %6 : vector<128x128xf32>
    %8 = arith.truncf %7 : vector<128x128xf32> to vector<128x128xbf16>
    %c0_6 = arith.constant 0 : index
    %c0_7 = arith.constant 0 : index
    %9 = vector.load %arg5[%c0_6, %c0_7] : memref<128x128xbf16, #tpu.memory_space<vmem>>, vector<128x128xbf16>
    tpu.vector_store %arg5[%c0_6, %c0_7], %8 {strides = array<i32>} : memref<128x128xbf16, #tpu.memory_space<vmem>>, vector<128x128xbf16>,
    return
  }
  func.func @transform_0(%arg0: i32, %arg1: i32) -> (i32, i32) {
    %c0_i32 = arith.constant 0 : i32
    %c0_i32_0 = arith.constant 0 : i32
    return %arg0, %c0_i32 : i32, i32
  }
  func.func @transform_1(%arg0: i32, %arg1: i32) -> (i32, i32) {
    %c0_i32 = arith.constant 0 : i32
    %c0_i32_0 = arith.constant 0 : i32
    return %c0_i32, %arg1 : i32, i32
  }
  func.func @transform_2(%arg0: i32, %arg1: i32) -> (i32, i32) {
    %c0_i32 = arith.constant 0 : i32
    %c0_i32_0 = arith.constant 0 : i32
    return %c0_i32, %arg1 : i32, i32
  }
  func.func @transform_3(%arg0: i32, %arg1: i32) -> (i32, i32) {
    %c0_i32 = arith.constant 0 : i32
    return %arg0, %arg1 : i32, i32
  }
}

</mosaic_0001>

<bundles_post_ra>
// kernel: tpu_custom_call.1
= control target key start
LH: loop header
LB: loop body
LE: loop exit
PB: predicated region body
PF: predicated region fallthrough
CT: control target
= control target key end

     0   :  { %s423_s0 = inlined_call_operand.vmem [shape: bf16[128,32], index: 0, kind: input, shape index: {}]   ;;  %s424_s1 = inlined_call_operand.vmem [shape: bf16[32,128], index: 1, kind: input, shape index: {}]   ;;  %s425_s2 = inlined_call_operand.vmem [shape: f32[1,128], index: 2, kind: input, shape index: {}]   ;;  %s426_s3 = inlined_call_operand.hbm [shape: bf16[128,128], index: 3, kind: output, shape index: {}]  }
   0x1   :  { %v233_v0 = vld [vmem:[%s424_s1 + $0x8] sm:$0xff]  ;;  %v235_v1 = vld [vmem:[%s423_s0] sm:$0xff]   ;;  %v307_v4 = vld [vmem:[%s423_s0 + $0x10] sm:$0xff]  }
   0x2   :  { %v236_v2 = vunpack.c.l.bf16 %v235_v1  ;;  %v237_v3 = vunpack.c.h.bf16 %v235_v1  ;;  %v309_v5 = vld [vmem:[%s423_s0 + $0x20] sm:$0xff]   ;;  %v311_v6 = vld [vmem:[%s423_s0 + $0x30] sm:$0xff]   ;;  %123 = vmatpush.bf16.msra.mxu0 %v233_v0  ;;  %320 = vmatpush.bf16.msra.mxu1 %v233_v0  ;;  %v244_v8 = vunpack.c.l.bf16 %v307_v4  ;;  %v245_v9 = vunpack.c.h.bf16 %v307_v4 }
   0x3   :  { %v232_v7 = vld [vmem:[%s424_s1] sm:$0xff]  ;;  %v252_v10 = vunpack.c.l.bf16 %v309_v5  ;;  %v253_v11 = vunpack.c.h.bf16 %v309_v5  ;;  %321 = vmatpush.bf16.msra.mxu2 %v233_v0  ;;  %322 = vmatpush.bf16.msra.mxu3 %v233_v0  ;;  %v260_v14 = vunpack.c.l.bf16 %v311_v6  ;;  %v261_v15 = vunpack.c.h.bf16 %v311_v6 }
   0x4   :  { %v48_v12 = vmax.f32 %v236_v2, 0.0  ;;  %v49_v13 = vmax.f32 %v237_v3, 0.0  ;;  %v52_v16 = vmax.f32 %v244_v8, 0.0  ;;  %v53_v17 = vmax.f32 %v245_v9, 0.0 }
   0x5   :  { %v56_v18 = vmax.f32 %v252_v10, 0.0  ;;  %v57_v19 = vmax.f32 %v253_v11, 0.0  ;;  %v60_v21 = vmax.f32 %v260_v14, 0.0  ;;  %v61_v22 = vmax.f32 %v261_v15, 0.0 }
   0x6   :  { %v64_v20 = vpack.c.bf16 %v49_v13, %v48_v12 }
   0x7   :  { %8 = vsyncpa [#allocation3], 0  ;;  %124 = vmatpush.bf16.msra.mxu0 %v232_v7  ;;  %323 = vmatpush.bf16.msra.mxu1 %v232_v7  ;;  %vm92_vm0 = vcmask 261120   ;;  %v66_v23 = vpack.c.bf16 %v53_v17, %v52_v16  ;;  %v68_v24 = vpack.c.bf16 %v57_v19, %v56_v18  ;;  %v70_v25 = vpack.c.bf16 %v61_v22, %v60_v21  ;;  %v306_v26 = vld [vmem:[%s423_s0 + $0x8] sm:$0xff]   ;;  %v308_v27 = vld [vmem:[%s423_s0 + $0x18] sm:$0xff]   ;;  %s204_s8 = sshll.u32 %s426_s3, 4  ;;  %s205_s8 = int_to_ptr.hbm [resolvable:$true] %s204_s8 }
   0x8   :  { %324 = vmatpush.bf16.msra.mxu2 %v232_v7  ;;  %325 = vmatpush.bf16.msra.mxu3 %v232_v7  ;;  %v310_v28 = vld [vmem:[%s423_s0 + $0x28] sm:$0xff]   ;;  %v312_v29 = vld [vmem:[%s423_s0 + $0x38] sm:$0xff]   ;;  %v240_v30 = vunpack.c.l.bf16 %v306_v26  ;;  %v241_v31 = vunpack.c.h.bf16 %v306_v26  ;;  %v248_v32 = vunpack.c.l.bf16 %v308_v27  ;;  %v249_v33 = vunpack.c.h.bf16 %v308_v27  ;;  %v329_v52 = vld [vmem:[%s425_s2] ss:$0 sm:$0xff]  ;;  %s356_s2 = smov [#allocation2]   ;;  %s357_s9 = smov 64  }
   0x9   :  { %v256_v34 = vunpack.c.l.bf16 %v310_v28  ;;  %v257_v35 = vunpack.c.h.bf16 %v310_v28  ;;  %v264_v36 = vunpack.c.l.bf16 %v312_v29  ;;  %v265_v37 = vunpack.c.h.bf16 %v312_v29  ;;  %s202_s5 = sshll.u32 %s356_s2, 4  ;;  %s358_s10 = smov 4   ;;  %s203_s5 = int_to_ptr.vmem [resolvable:$true] %s202_s5 }
   0xa   :  { %224 = vmatmul.msk.bf16.vlgmr.msra.gmra.mxu0 %vm92_vm0, %v64_v20  ;;  %226 = vmatmul.msk.bf16.vlgmr.msra.gmra.mxu1 %vm92_vm0, %v66_v23  ;;  %v50_v38 = vmax.f32 %v240_v30, 0.0  ;;  %v51_v39 = vmax.f32 %v241_v31, 0.0  ;;  %v54_v40 = vmax.f32 %v248_v32, 0.0  ;;  %v55_v41 = vmax.f32 %v249_v33, 0.0 }
   0xb   :  { %228 = vmatmul.msk.bf16.vlgmr.msra.gmra.mxu2 %vm92_vm0, %v68_v24  ;;  %230 = vmatmul.msk.bf16.vlgmr.msra.gmra.mxu3 %vm92_vm0, %v70_v25  ;;  %v58_v42 = vmax.f32 %v256_v34, 0.0  ;;  %v59_v43 = vmax.f32 %v257_v35, 0.0  ;;  %v62_v44 = vmax.f32 %v264_v36, 0.0  ;;  %v63_v45 = vmax.f32 %v265_v37, 0.0 }
   0xc   :  { %v65_v46 = vpack.c.bf16 %v51_v39, %v50_v38  ;;  %v67_v47 = vpack.c.bf16 %v55_v41, %v54_v40 }
   0xd   :  { %v69_v48 = vpack.c.bf16 %v59_v43, %v58_v42  ;;  %v71_v49 = vpack.c.bf16 %v63_v45, %v62_v44 }
  0x1a   :  { %225 = vmatmul.msk.bf16.gmra.mxu0 %vm92_vm0, %v65_v46  ;;  %227 = vmatmul.msk.bf16.gmra.mxu1 %vm92_vm0, %v67_v47 }
  0x1b   :  { %229 = vmatmul.msk.bf16.gmra.mxu2 %vm92_vm0, %v69_v48  ;;  %231 = vmatmul.msk.bf16.gmra.mxu3 %vm92_vm0, %v71_v49 }
  0x87   :  { %v126_v50 = vpop.f32.mrf.mxu0  ;;  %v136_v51 = vpop.f32.mrf.mxu1 }
  0x88   :  { %v127_v57 = vadd.f32 %v329_v52, %v126_v50  ;;  %v137_v58 = vadd.f32 %v329_v52, %v136_v51 }
  0x8e   :  { %v146_v53 = vpop.f32.mrf.mxu2  ;;  %v156_v54 = vpop.f32.mrf.mxu3 }
  0x8f   :  { %v128_v55 = vpop.f32.mrf.mxu0  ;;  %v138_v56 = vpop.f32.mrf.mxu1  ;;  %v147_v1 = vadd.f32 %v329_v52, %v146_v53  ;;  %v157_v2 = vadd.f32 %v329_v52, %v156_v54 }
  0x90   :  { %v129_v59 = vadd.f32 %v329_v52, %v128_v55  ;;  %v139_v60 = vadd.f32 %v329_v52, %v138_v56 }
  0x92   :  { %v269_v61 = vpack.c.bf16 %v129_v59, %v127_v57  ;;  %v279_v62 = vpack.c.bf16 %v139_v60, %v137_v58 }
  0x94   :  { %270 = vst [vmem:[#allocation2] sm:$0xff] %v269_v61  }
  0x95   :  { %314 = vst [vmem:[#allocation2 + $0x10] sm:$0xff] %v279_v62  }
  0x96   :  { %v148_v63 = vpop.f32.mrf.mxu2  ;;  %v158_v0 = vpop.f32.mrf.mxu3 }
  0x97   :  { %v149_v3 = vadd.f32 %v329_v52, %v148_v63  ;;  %v159_v4 = vadd.f32 %v329_v52, %v158_v0  ;;  %v131_v5 = vpop.f32.mrf.mxu0  ;;  %v141_v6 = vpop.f32.mrf.mxu1 }
  0x98   :  { %v132_v13 = vadd.f32 %v329_v52, %v131_v5  ;;  %v142_v14 = vadd.f32 %v329_v52, %v141_v6 }
  0x99   :  { %v289_v7 = vpack.c.bf16 %v149_v3, %v147_v1  ;;  %v299_v8 = vpack.c.bf16 %v159_v4, %v157_v2 }
  0x9b   :  { %316 = vst [vmem:[#allocation2 + $0x20] sm:$0xff] %v289_v7  }
  0x9c   :  { %318 = vst [vmem:[#allocation2 + $0x30] sm:$0xff] %v299_v8  }
  0x9e   :  { %v151_v9 = vpop.f32.mrf.mxu2  ;;  %v161_v10 = vpop.f32.mrf.mxu3 }
  0x9f   :  { %v133_v11 = vpop.f32.mrf.mxu0  ;;  %v143_v12 = vpop.f32.mrf.mxu1  ;;  %v152_v21 = vadd.f32 %v329_v52, %v151_v9  ;;  %v162_v22 = vadd.f32 %v329_v52, %v161_v10 }
  0xa0   :  { %v134_v15 = vadd.f32 %v329_v52, %v133_v11  ;;  %v144_v16 = vadd.f32 %v329_v52, %v143_v12 }
  0xa2   :  { %v274_v17 = vpack.c.bf16 %v134_v15, %v132_v13  ;;  %v284_v18 = vpack.c.bf16 %v144_v16, %v142_v14 }
  0xa4   :  { %313 = vst [vmem:[#allocation2 + $0x8] sm:$0xff] %v274_v17  }
  0xa5   :  { %315 = vst [vmem:[#allocation2 + $0x18] sm:$0xff] %v284_v18  }
  0xa6   :  { %v153_v19 = vpop.f32.mrf.mxu2  ;;  %v163_v20 = vpop.f32.mrf.mxu3 }
  0xa7   :  { %v154_v23 = vadd.f32 %v329_v52, %v153_v19  ;;  %v164_v24 = vadd.f32 %v329_v52, %v163_v20 }
  0xa9   :  { %v294_v25 = vpack.c.bf16 %v154_v23, %v152_v21  ;;  %v304_v26 = vpack.c.bf16 %v164_v24, %v162_v22 }
  0xab   :  { %317 = vst [vmem:[#allocation2 + $0x28] sm:$0xff] %v294_v25  }
  0xac   :  { %319 = vst [vmem:[#allocation2 + $0x38] sm:$0xff] %v304_v26  }
  0xad   :  { %210 = dma.vmem_to_hbm [thread:$0]  %s203_s5, 1024, %s205_s8, [#allocation3], %s357_s9, %s357_s9, %s358_s10  }
  0xae   :  { %354 = dma.done.wait [#allocation3], 1024  }
  0xaf   :  { %355 = vsyncadd [#allocation3], 4294966272 }
  0xb0   :  { %215 = vsyncpa [#allocation3], 1 }

</bundles_post_ra>
